<compile_context>
chip_gen: v7x
topology: tpu7x:2x2x1
jax: 0.10.0
libtpu: 0.0.40
codegen_flags: <defaults>
</compile_context>

<pallas_src>
import functools

import jax
import jax.numpy as jnp
from jax.experimental import pallas as pl
from jax.experimental.pallas import tpu as pltpu


def _up_kernel(alpha_ref, x_ref, w_ref, b_ref, o_ref, *, c_in, use_mxu):
    # alpha_ref: (1, 1) f32 scalar in SMEM (PReLU negative slope)
    # x_ref:     (C_in,  T)    spatial tile, lane-dense
    # w_ref:     (C_out, C_in) 1x1 conv weight (native dtype for MXU, f32 for VPU)
    # b_ref:     (C_out, 1)    f32 bias column
    # o_ref:     (C_out, T)    lane-dense output tile
    if use_mxu:
        # Realistic channel counts: MXU matmul with f32 accumulation, operands
        # kept in their native dtype (bf16 runs at full MXU rate).
        y = jnp.dot(w_ref[...], x_ref[...], preferred_element_type=jnp.float32)
    else:
        # Tiny C: unrolled rank-1 updates on the VPU (MXU would be <1% used).
        # f32 math is mandatory here (v5e VPU has no bf16).
        x = x_ref[...].astype(jnp.float32)
        w = w_ref[...]                      # already f32 (hoisted cast)
        y = w[:, 0:1] * x[0:1, :]
        for ci in range(1, c_in):
            y = y + w[:, ci:ci + 1] * x[ci:ci + 1, :]

    y = y + b_ref[...]                      # (C_out,1) broadcast over lanes
    alpha = alpha_ref[0, 0]
    o_ref[...] = jnp.where(y > 0, y, alpha * y).astype(o_ref.dtype)


def _round_up_128(v):
    return pl.cdiv(v, 128) * 128


def _pick_tile_and_vmem(HW, N, C_in, C_out, itemsize):
    """Lane-aligned spatial tile + scoped-VMEM limit, per-generation aware."""
    try:
        vmem_cap = int(pltpu.get_tpu_info().vmem_capacity_bytes)
    except Exception:
        vmem_cap = 64 * 2**20                       # conservative (v7x)
    vmem_limit = int(min(0.75 * vmem_cap, 100 * 2**20))

    # Double-buffered input block + output block, per lane column.
    bytes_per_col = 2 * (C_in + C_out) * itemsize
    tile_by_vmem = (int(0.5 * vmem_limit) // bytes_per_col) // 128 * 128
    tile = min(max(128, tile_by_vmem), 32768, _round_up_128(HW))

    # v7x: 2 TensorCores shard "parallel" grid axes -> make sure there are at
    # least 2 grid points when batch == 1.
    if N == 1 and HW > 128:
        tile = min(tile, max(128, _round_up_128(pl.cdiv(HW, 2))))
    tile = max(128, tile)
    return tile, vmem_limit


def conv1x1_prelu_nchw(x_nchw, w_oi, b, alpha):
    """Fused 1x1-conv + bias + PReLU on an NCHW tensor (spatial lane-dense).

    x_nchw: (N, C_in, H, W)   w_oi: (C_out, C_in)   b: (C_out,)   alpha: scalar
    Returns (N, C_out, H, W) in x's dtype.
    """
    N, C_in, H, W = x_nchw.shape
    C_out = w_oi.shape[0]
    HW = H * W

    x = x_nchw.reshape(N, C_in, HW)
    itemsize = jnp.dtype(x_nchw.dtype).itemsize
    tile, vmem_limit = _pick_tile_and_vmem(HW, N, C_in, C_out, itemsize)
    num_tiles = pl.cdiv(HW, tile)

    # NOTE: MXU cutoff could drop to ~32 on v5e (128-wide MXU, no bf16 VALU);
    # kept at 64 since the op is HBM-bound and the delta is marginal.
    use_mxu = C_in >= 64
    # Hoisted casts: MXU path gets native-dtype weights, VPU path gets f32.
    w_k = w_oi.astype(x_nchw.dtype) if use_mxu else w_oi.astype(jnp.float32)
    b_col = b.reshape(C_out, 1).astype(jnp.float32)
    alpha_smem = jnp.asarray(alpha, jnp.float32).reshape(1, 1)

    kernel = functools.partial(_up_kernel, c_in=C_in, use_mxu=use_mxu)

    y = pl.pallas_call(
        kernel,
        out_shape=jax.ShapeDtypeStruct((N, C_out, HW), x_nchw.dtype),
        grid_spec=pl.GridSpec(
            grid=(N, num_tiles),
            in_specs=[
                pl.BlockSpec(memory_space=pltpu.MemorySpace.SMEM),         # alpha
                pl.BlockSpec((None, C_in, tile), lambda n, t: (n, 0, t)),  # x
                pl.BlockSpec((C_out, C_in), lambda n, t: (0, 0)),          # weight
                pl.BlockSpec((C_out, 1), lambda n, t: (0, 0)),             # bias
            ],
            out_specs=pl.BlockSpec((None, C_out, tile), lambda n, t: (n, 0, t)),
        ),
        compiler_params=pltpu.CompilerParams(
            dimension_semantics=("parallel", "parallel"),
            vmem_limit_bytes=vmem_limit,
        ),
    )(alpha_smem, x, w_k, b_col)

    return y.reshape(N, C_out, H, W)


def pixel_shuffle(x_nchw, r=2):
    """PyTorch nn.PixelShuffle semantics on NCHW input (single layout pass)."""
    N, C, H, W = x_nchw.shape
    C_out = C // (r * r)
    x = x_nchw.reshape(N, C_out, r, r, H, W)
    x = x.transpose(0, 1, 4, 2, 5, 3)
    return x.reshape(N, C_out, H * r, W * r)


def up_forward(x_nchw, conv_w, conv_b, prelu_alpha):
    """Forward pass of _up.  x_nchw: (N, C, H, W) -> (N, C//4, 2H, 2W)."""
    # Conv2d weight (C_out, C_in, 1, 1) -> (C_out, C_in); no transpose needed
    # because the kernel computes W @ x directly on NCHW data.
    w_oi = conv_w[:, :, 0, 0]
    y = conv1x1_prelu_nchw(x_nchw, w_oi, conv_b, prelu_alpha)
    return pixel_shuffle(y, r=2)


if __name__ == "__main__":
    # Small shapes consistent with the module (channel_in % 4 == 0 for
    # PixelShuffle(2)).  HW = 256 -> one lane-dense 256-wide tile per batch.
    N, C, H, W = 2, 8, 16, 16

    key = jax.random.PRNGKey(0)
    kx, kw, kb = jax.random.split(key, 3)

    x = jax.random.normal(kx, (N, C, H, W), dtype=jnp.float32)
    conv_w = jax.random.normal(kw, (C, C, 1, 1), dtype=jnp.float32) * 0.1
    conv_b = jax.random.normal(kb, (C,), dtype=jnp.float32) * 0.1
    prelu_alpha = 0.25  # nn.PReLU() default: single shared parameter

    out = jax.jit(up_forward)(x, conv_w, conv_b, prelu_alpha)
    out = jax.block_until_ready(out)

    # Pure-JAX reference: 1x1 conv + bias + PReLU + pixel shuffle.
    y_ref = jnp.einsum("oc,nchw->nohw", conv_w[:, :, 0, 0], x)
    y_ref = y_ref + conv_b[None, :, None, None]
    y_ref = jnp.where(y_ref > 0, y_ref, prelu_alpha * y_ref)
    out_ref = pixel_shuffle(y_ref, r=2)

    assert out.shape == (N, C // 4, 2 * H, 2 * W), out.shape
    assert jnp.allclose(out, out_ref, atol=1e-5, rtol=1e-5)
    print("KERNEL_OK")
</pallas_src>

<mosaic_0001>
module attributes {stable_mosaic.version = 11 : i64} {
  func.func @_up_kernel(%arg0: i32, %arg1: i32, %arg2: memref<1x1xf32, #tpu.memory_space<smem>>, %arg3: memref<1x8x256xf32, #tpu.memory_space<vmem>>, %arg4: memref<8x8xf32, #tpu.memory_space<vmem>>, %arg5: memref<8x1xf32, #tpu.memory_space<vmem>>, %arg6: memref<1x8x256xf32, #tpu.memory_space<vmem>>) attributes {dimension_semantics = [#tpu.dimension_semantics<parallel>, #tpu.dimension_semantics<parallel>], iteration_bounds = array<i64: 2, 1>, scalar_prefetch = 0 : i64, scratch_operands = 0 : i64, tpu.core_type = #tpu.core_type<tc>, window_params = [{transform_indices = @transform_0, window_bounds = array<i64: 1, 1>}, {transform_indices = @transform_1, window_bounds = array<i64: 1, 8, 256>}, {pipeline_mode = #tpu.pipeline_mode<synchronous>, transform_indices = @transform_2, window_bounds = array<i64: 8, 8>}, {pipeline_mode = #tpu.pipeline_mode<synchronous>, transform_indices = @transform_3, window_bounds = array<i64: 8, 1>}, {transform_indices = @transform_4, window_bounds = array<i64: 1, 8, 256>}]} {
    %c0 = arith.constant 0 : index
    %c0_0 = arith.constant 0 : index
    %c0_1 = arith.constant 0 : index
    %0 = vector.load %arg3[%c0, %c0_0, %c0_1] : memref<1x8x256xf32, #tpu.memory_space<vmem>>, vector<1x8x256xf32>
    %1 = vector.shape_cast %0 : vector<1x8x256xf32> to vector<8x256xf32>
    %c0_2 = arith.constant 0 : index
    %c0_3 = arith.constant 0 : index
    %2 = vector.load %arg4[%c0_2, %c0_3] : memref<8x8xf32, #tpu.memory_space<vmem>>, vector<8x8xf32>
    %3 = vector.extract_strided_slice %2 {offsets = [0, 0], sizes = [8, 1], strides = [1, 1]} : vector<8x8xf32> to vector<8x1xf32>
    %4 = vector.extract_strided_slice %1 {offsets = [0, 0], sizes = [1, 256], strides = [1, 1]} : vector<8x256xf32> to vector<1x256xf32>
    %5 = vector.broadcast %3 : vector<8x1xf32> to vector<8x256xf32>
    %6 = vector.broadcast %4 : vector<1x256xf32> to vector<8x256xf32>
    %7 = arith.mulf %5, %6 : vector<8x256xf32>
    %8 = vector.extract_strided_slice %2 {offsets = [0, 1], sizes = [8, 1], strides = [1, 1]} : vector<8x8xf32> to vector<8x1xf32>
    %9 = vector.extract_strided_slice %1 {offsets = [1, 0], sizes = [1, 256], strides = [1, 1]} : vector<8x256xf32> to vector<1x256xf32>
    %10 = vector.broadcast %8 : vector<8x1xf32> to vector<8x256xf32>
    %11 = vector.broadcast %9 : vector<1x256xf32> to vector<8x256xf32>
    %12 = arith.mulf %10, %11 : vector<8x256xf32>
    %13 = arith.addf %7, %12 : vector<8x256xf32>
    %14 = vector.extract_strided_slice %2 {offsets = [0, 2], sizes = [8, 1], strides = [1, 1]} : vector<8x8xf32> to vector<8x1xf32>
    %15 = vector.extract_strided_slice %1 {offsets = [2, 0], sizes = [1, 256], strides = [1, 1]} : vector<8x256xf32> to vector<1x256xf32>
    %16 = vector.broadcast %14 : vector<8x1xf32> to vector<8x256xf32>
    %17 = vector.broadcast %15 : vector<1x256xf32> to vector<8x256xf32>
    %18 = arith.mulf %16, %17 : vector<8x256xf32>
    %19 = arith.addf %13, %18 : vector<8x256xf32>
    %20 = vector.extract_strided_slice %2 {offsets = [0, 3], sizes = [8, 1], strides = [1, 1]} : vector<8x8xf32> to vector<8x1xf32>
    %21 = vector.extract_strided_slice %1 {offsets = [3, 0], sizes = [1, 256], strides = [1, 1]} : vector<8x256xf32> to vector<1x256xf32>
    %22 = vector.broadcast %20 : vector<8x1xf32> to vector<8x256xf32>
    %23 = vector.broadcast %21 : vector<1x256xf32> to vector<8x256xf32>
    %24 = arith.mulf %22, %23 : vector<8x256xf32>
    %25 = arith.addf %19, %24 : vector<8x256xf32>
    %26 = vector.extract_strided_slice %2 {offsets = [0, 4], sizes = [8, 1], strides = [1, 1]} : vector<8x8xf32> to vector<8x1xf32>
    %27 = vector.extract_strided_slice %1 {offsets = [4, 0], sizes = [1, 256], strides = [1, 1]} : vector<8x256xf32> to vector<1x256xf32>
    %28 = vector.broadcast %26 : vector<8x1xf32> to vector<8x256xf32>
    %29 = vector.broadcast %27 : vector<1x256xf32> to vector<8x256xf32>
    %30 = arith.mulf %28, %29 : vector<8x256xf32>
    %31 = arith.addf %25, %30 : vector<8x256xf32>
    %32 = vector.extract_strided_slice %2 {offsets = [0, 5], sizes = [8, 1], strides = [1, 1]} : vector<8x8xf32> to vector<8x1xf32>
    %33 = vector.extract_strided_slice %1 {offsets = [5, 0], sizes = [1, 256], strides = [1, 1]} : vector<8x256xf32> to vector<1x256xf32>
    %34 = vector.broadcast %32 : vector<8x1xf32> to vector<8x256xf32>
    %35 = vector.broadcast %33 : vector<1x256xf32> to vector<8x256xf32>
    %36 = arith.mulf %34, %35 : vector<8x256xf32>
    %37 = arith.addf %31, %36 : vector<8x256xf32>
    %38 = vector.extract_strided_slice %2 {offsets = [0, 6], sizes = [8, 1], strides = [1, 1]} : vector<8x8xf32> to vector<8x1xf32>
    %39 = vector.extract_strided_slice %1 {offsets = [6, 0], sizes = [1, 256], strides = [1, 1]} : vector<8x256xf32> to vector<1x256xf32>
    %40 = vector.broadcast %38 : vector<8x1xf32> to vector<8x256xf32>
    %41 = vector.broadcast %39 : vector<1x256xf32> to vector<8x256xf32>
    %42 = arith.mulf %40, %41 : vector<8x256xf32>
    %43 = arith.addf %37, %42 : vector<8x256xf32>
    %44 = vector.extract_strided_slice %2 {offsets = [0, 7], sizes = [8, 1], strides = [1, 1]} : vector<8x8xf32> to vector<8x1xf32>
    %45 = vector.extract_strided_slice %1 {offsets = [7, 0], sizes = [1, 256], strides = [1, 1]} : vector<8x256xf32> to vector<1x256xf32>
    %46 = vector.broadcast %44 : vector<8x1xf32> to vector<8x256xf32>
    %47 = vector.broadcast %45 : vector<1x256xf32> to vector<8x256xf32>
    %48 = arith.mulf %46, %47 : vector<8x256xf32>
    %49 = arith.addf %43, %48 : vector<8x256xf32>
    %c0_4 = arith.constant 0 : index
    %c0_5 = arith.constant 0 : index
    %50 = vector.load %arg5[%c0_4, %c0_5] : memref<8x1xf32, #tpu.memory_space<vmem>>, vector<8x1xf32>
    %51 = vector.broadcast %50 : vector<8x1xf32> to vector<8x256xf32>
    %52 = arith.addf %49, %51 : vector<8x256xf32>
    %c0_6 = arith.constant 0 : index
    %c0_7 = arith.constant 0 : index
    %53 = memref.load %arg2[%c0_6, %c0_7] : memref<1x1xf32, #tpu.memory_space<smem>>
    %cst = arith.constant 0.000000e+00 : f32
    %54 = vector.broadcast %cst : f32 to vector<8x256xf32>
    %55 = arith.cmpf ogt, %52, %54 : vector<8x256xf32>
    %56 = vector.broadcast %53 : f32 to vector<8x256xf32>
    %57 = arith.mulf %56, %52 : vector<8x256xf32>
    %58 = arith.select %55, %52, %57 : vector<8x256xi1>, vector<8x256xf32>
    %c0_8 = arith.constant 0 : index
    %c0_9 = arith.constant 0 : index
    %c0_10 = arith.constant 0 : index
    %59 = vector.load %arg6[%c0_8, %c0_9, %c0_10] : memref<1x8x256xf32, #tpu.memory_space<vmem>>, vector<1x8x256xf32>
    %60 = vector.shape_cast %59 : vector<1x8x256xf32> to vector<8x256xf32>
    %61 = vector.shape_cast %58 : vector<8x256xf32> to vector<1x8x256xf32>
    tpu.vector_store %arg6[%c0_8, %c0_9, %c0_10], %61 {strides = array<i32>} : memref<1x8x256xf32, #tpu.memory_space<vmem>>, vector<1x8x256xf32>,
    return
  }
  func.func @transform_0(%arg0: i32, %arg1: i32) -> (i32, i32) {
    %c0_i32 = arith.constant 0 : i32
    %c0_i32_0 = arith.constant 0 : i32
    %c0_i32_1 = arith.constant 0 : i32
    return %c0_i32, %c0_i32_0 : i32, i32
  }
  func.func @transform_1(%arg0: i32, %arg1: i32) -> (i32, i32, i32) {
    %c0_i32 = arith.constant 0 : i32
    %c0_i32_0 = arith.constant 0 : i32
    return %arg0, %c0_i32, %arg1 : i32, i32, i32
  }
  func.func @transform_2(%arg0: i32, %arg1: i32) -> (i32, i32) {
    %c0_i32 = arith.constant 0 : i32
    %c0_i32_0 = arith.constant 0 : i32
    %c0_i32_1 = arith.constant 0 : i32
    return %c0_i32, %c0_i32_0 : i32, i32
  }
  func.func @transform_3(%arg0: i32, %arg1: i32) -> (i32, i32) {
    %c0_i32 = arith.constant 0 : i32
    %c0_i32_0 = arith.constant 0 : i32
    %c0_i32_1 = arith.constant 0 : i32
    return %c0_i32, %c0_i32_0 : i32, i32
  }
  func.func @transform_4(%arg0: i32, %arg1: i32) -> (i32, i32, i32) {
    %c0_i32 = arith.constant 0 : i32
    %c0_i32_0 = arith.constant 0 : i32
    return %arg0, %c0_i32, %arg1 : i32, i32, i32
  }
}

</mosaic_0001>

<bundles_post_ra>
// kernel: up_forward.1
= control target key start
LH: loop header
LB: loop body
LE: loop exit
PB: predicated region body
PF: predicated region fallthrough
CT: control target
= control target key end

     0   :  { %s587_s17 = smov 0   ;;  %s589_s18 = smov 0   ;;  %s637_s0 = inlined_call_operand.<no memory space> [shape: f32[1,1], index: 0, kind: input, shape index: {}]   ;;  %s638_s1 = inlined_call_operand.vmem [shape: f32[2,8,256], index: 1, kind: input, shape index: {}]   ;;  %s639_s2 = inlined_call_operand.vmem [shape: f32[8,8], index: 2, kind: input, shape index: {}]   ;;  %s640_s3 = inlined_call_operand.vmem [shape: f32[8,1], index: 3, kind: input, shape index: {}]   ;;  %s641_s4 = inlined_call_operand.vmem [shape: f32[2,8,256], index: 4, kind: output, shape index: {}]  }
   0x1   :  { %9 = sst [smem:[#allocation2]] %s637_s0  ;;  %s591_s19 = smov 0  }
   0x2 LB: > { %s27_s0 = sadd.s32 1, %s545_s18  ;;  %p477_p0 = scmp.ge.s32.totalorder %s549_s19, 1  ;;  %s549_s19 = sphi %s591_s19, %s15_s19   ;;  %s545_s18 = sphi %s589_s18, %s643_s18   ;;  %s541_s17 = sphi %s587_s17, %s642_s17  }
   0x3   : > { %p29_p1 = scmp.ge.s32.totalorder %s27_s0, 2  ;;  %p184_p2 = scmp.lt.s32.totalorder %s549_s19, 3 }
   0x5   : > { %s645_s0 = smov (%p29_p1, %s27_s0), 0  ;;  %p185_p3 = pnand %p477_p0, %p184_p2 }
   0x6   : > { %v240_v0 = vld [vmem:[%s639_s2] sm:$0xff] (!%p185_p3)  ;;  %v551_v1 = vmov (!%p185_p3), 2   ;;  %v552_v2 = vmov (!%p185_p3), 0   ;;  %v553_v3 = vmov (!%p185_p3), 3   ;;  %v554_v4 = vmov (!%p185_p3), 1   ;;  %p219_p4 = scmp.lt.s32.totalorder (!%p185_p3), %s541_s17, 1 }
   0x7   : > { %188 = sbr.rel (%p185_p3) target bundleno = 166 (0xa6), region = 36  ;;  %520 = vset.pattern.permute.xlu1 (!%p185_p3), %v551_v1  ;;  %518 = vset.pattern.permute.xlu0 (!%p185_p3), %v552_v2  ;;  %v555_v5 = vmov (!%p185_p3), 4   ;;  %v556_v6 = vmov (!%p185_p3), 5   ;;  %v368_v7 = vld [vmem:[%s640_s3] sm:$0xff] (!%p185_p3)  ;;  %v557_v8 = vmov (!%p185_p3), 6   ;;  %v558_v9 = vmov (!%p185_p3), 7  }
   0x8   : > { %273 = vperm.xlu1 (!%p185_p3), %520, %v240_v0   ;;  %243 = vperm.xlu0 (!%p185_p3), %518, %v240_v0   ;;  %v246_v10 = vlaneseq (!%p185_p3)  ;;  %s376_s28 = sld [smem:[#allocation2]] (!%p185_p3) }
   0xa   : > { %v247_v11 = vshrl.u32 (!%p185_p3), %v246_v10, 7 }
   0xc   : > { %521 = vset.pattern.permute.xlu1 (!%p185_p3), %v553_v3  ;;  %519 = vset.pattern.permute.xlu0 (!%p185_p3), %v554_v4  ;;  %v248_v12 = vsub.s32 (!%p185_p3), 0, %v247_v11  ;;  %v262_v13 = vsub.s32 (!%p185_p3), 1, %v247_v11  ;;  %v278_v14 = vsub.s32 (!%p185_p3), 2, %v247_v11  ;;  %v294_v19 = vsub.s32 (!%p185_p3), 3, %v247_v11 }
   0xd   : > { %289 = vperm.xlu1 (!%p185_p3), %521, %v240_v0   ;;  %257 = vperm.xlu0 (!%p185_p3), %519, %v240_v0   ;;  %v310_v24 = vsub.s32 (!%p185_p3), 4, %v247_v11  ;;  %v326_v31 = vsub.s32 (!%p185_p3), 5, %v247_v11  ;;  %v342_v44 = vsub.s32 (!%p185_p3), 6, %v247_v11  ;;  %v358_v55 = vsub.s32 (!%p185_p3), 7, %v247_v11 }
   0xe   : > { %s647_s17 = smov (!%p219_p4, %s541_s17), 1 }
   0xf   : > { %s484_s24 = sshll.u32 %s647_s17, 4 }
  0x10   : > { %s226_s27 = scalar_lea.vmem %s638_s1, %s484_s24  ;;  %s236_s5 = scalar_lea.vmem %s641_s4, %s484_s24 }
  0x11   : > { %522 = vset.pattern.permute.xlu1 %v555_v5  ;;  %523 = vset.pattern.permute.xlu0 %v556_v6  ;;  %v238_v17 = vld [vmem:[%s226_s27] sm:$0xff]  ;;  %v239_v18 = vld [vmem:[%s226_s27 + $0x8] sm:$0xff] }
  0x12   : > { %305 = vperm.xlu1 %522, %v240_v0   ;;  %321 = vperm.xlu0 %523, %v240_v0   ;;  %v249_v20 = vrot.slane %v238_v17, %v248_v12  ;;  %v253_v21 = vrot.slane %v239_v18, %v248_v12  ;;  %v263_v22 = vrot.slane %v238_v17, %v262_v13 }
  0x13   : > { %v267_v23 = vrot.slane %v239_v18, %v262_v13  ;;  %v279_v25 = vrot.slane %v238_v17, %v278_v14  ;;  %v283_v26 = vrot.slane %v239_v18, %v278_v14  ;;  %v295_v28 = vrot.slane %v238_v17, %v294_v19 }
  0x14   : > { %v299_v29 = vrot.slane %v239_v18, %v294_v19  ;;  %v311_v36 = vrot.slane %v238_v17, %v310_v24  ;;  %v315_v37 = vrot.slane %v239_v18, %v310_v24  ;;  %v327_v42 = vrot.slane %v238_v17, %v326_v31 }
  0x15   : > { %v331_v43 = vrot.slane %v239_v18, %v326_v31  ;;  %v343_v58 = vrot.slane %v238_v17, %v342_v44  ;;  %v347_v59 = vrot.slane %v239_v18, %v342_v44  ;;  %v359_v63 = vrot.slane %v238_v17, %v358_v55 }
  0x16   : > { %524 = vset.pattern.permute.xlu1 %v557_v8  ;;  %526 = vset.pattern.permute.xlu0 %v552_v2  ;;  %v379_v13 = vstv %s376_s28 }
  0x17   : > { %337 = vperm.xlu1 %524, %v240_v0   ;;  %371 = vperm.xlu0 %526, %v368_v7  }
  0x1b   : > { %525 = vset.pattern.permute.xlu1 %v558_v9 }
  0x1c   : > { %353 = vperm.xlu1 %525, %v240_v0   ;;  %v363_v0 = vrot.slane %v239_v18, %v358_v55 }
  0x87   : > { %v274_v15 = vpop.permute.xlu1 %273  ;;  %v244_v16 = vpop.permute.xlu0 %243 }
  0x88   : > { %v254_v32 = vmul.f32 %v249_v20, %v244_v16  ;;  %v255_v33 = vmul.f32 %v253_v21, %v244_v16  ;;  %v284_v38 = vmul.f32 %v279_v25, %v274_v15  ;;  %v285_v39 = vmul.f32 %v283_v26, %v274_v15 }
  0x8c   : > { %v290_v27 = vpop.permute.xlu1 %289  ;;  %v258_v30 = vpop.permute.xlu0 %257 }
  0x8d   : > { %v268_v34 = vmul.f32 %v263_v22, %v258_v30  ;;  %v269_v35 = vmul.f32 %v267_v23, %v258_v30  ;;  %v300_v45 = vmul.f32 %v295_v28, %v290_v27  ;;  %v301_v46 = vmul.f32 %v299_v29, %v290_v27 }
  0x8f   : > { %v270_v40 = vadd.f32 %v268_v34, %v254_v32  ;;  %v271_v41 = vadd.f32 %v269_v35, %v255_v33 }
  0x91   : > { %v286_v47 = vadd.f32 %v284_v38, %v270_v40  ;;  %v287_v48 = vadd.f32 %v285_v39, %v271_v41  ;;  %v306_v49 = vpop.permute.xlu1 %305  ;;  %v322_v50 = vpop.permute.xlu0 %321 }
  0x92   : > { %v316_v51 = vmul.f32 %v311_v36, %v306_v49  ;;  %v317_v52 = vmul.f32 %v315_v37, %v306_v49  ;;  %v332_v56 = vmul.f32 %v327_v42, %v322_v50  ;;  %v333_v57 = vmul.f32 %v331_v43, %v322_v50 }
  0x93   : > { %v302_v53 = vadd.f32 %v300_v45, %v286_v47  ;;  %v303_v54 = vadd.f32 %v301_v46, %v287_v48 }
  0x95   : > { %v318_v60 = vadd.f32 %v316_v51, %v302_v53  ;;  %v319_v61 = vadd.f32 %v317_v52, %v303_v54 }
  0x96   : > { %v338_v62 = vpop.permute.xlu1 %337  ;;  %v372_v10 = vpop.permute.xlu0 %371 }
  0x97   : > { %v334_v1 = vadd.f32 %v332_v56, %v318_v60  ;;  %v335_v2 = vadd.f32 %v333_v57, %v319_v61  ;;  %v348_v3 = vmul.f32 %v343_v58, %v338_v62  ;;  %v349_v4 = vmul.f32 %v347_v59, %v338_v62 }
  0x99   : > { %v350_v6 = vadd.f32 %v348_v3, %v334_v1  ;;  %v351_v7 = vadd.f32 %v349_v4, %v335_v2 }
  0x9b   : > { %v354_v5 = vpop.permute.xlu1 %353 }
  0x9c   : > { %v364_v8 = vmul.f32 %v359_v63, %v354_v5  ;;  %v365_v9 = vmul.f32 %v363_v0, %v354_v5 }
  0x9e   : > { %v366_v11 = vadd.f32 %v364_v8, %v350_v6  ;;  %v367_v12 = vadd.f32 %v365_v9, %v351_v7 }
  0xa0   : > { %v374_v14 = vadd.f32 %v372_v10, %v366_v11  ;;  %v375_v15 = vadd.f32 %v372_v10, %v367_v12 }
  0xa2   : > { %vm377_vm0 = vcmp.gt.f32.partialorder %v374_v14, 0.0  ;;  %vm378_vm1 = vcmp.gt.f32.partialorder %v375_v15, 0.0  ;;  %v380_v16 = vmul.f32 %v379_v13, %v374_v14  ;;  %v381_v17 = vmul.f32 %v379_v13, %v375_v15 }
  0xa4   : > { %v382_v18 = vsel %vm377_vm0, %v374_v14, %v380_v16  ;;  %v383_v19 = vsel %vm378_vm1, %v375_v15, %v381_v17 }
  0xa5   : > { %384 = vst [vmem:[%s236_s5] sm:$0xff] %v382_v18  ;;  %385 = vst [vmem:[%s236_s5 + $0x8] sm:$0xff] %v383_v19 }
  0xa6 PF: > { %s15_s19 = sadd.s32 1, %s549_s19   ;;  %s642_s17 = smov %s545_s18 }
  0xa7   : > { %p12_p5 = scmp.ge.s32.totalorder %s15_s19, 4   ;;  %s643_s18 = smov %s645_s0 }
  0xa9   :  { %14 = sbr.rel (!%p12_p5) target bundleno = 2 (0x2), region = 66 }

</bundles_post_ra>
